<compile_context>
chip_gen: v7x
topology: tpu7x:2x2x1
jax: 0.10.0
libtpu: 0.0.40
codegen_flags: <defaults>
</compile_context>

<pallas_src>
import jax
import jax.numpy as jnp
from jax.experimental import pallas as pl
from jax.experimental.pallas import tpu as pltpu


def actor_kernel(x_ref, w1_ref, b1_ref, w2_ref, b2_ref, out_ref):
    # Hidden layer: Linear -> Tanh   (MXU matmul + EUP tanh, all f32).
    h = jnp.tanh(
        jnp.dot(x_ref[...], w1_ref[...], preferred_element_type=jnp.float32)
        + b1_ref[...]
    )
    # Output layer: Linear straight to the real action dim (no lane padding).
    logits = (
        jnp.dot(h, w2_ref[...], preferred_element_type=jnp.float32) + b2_ref[...]
    )
    # Numerically-stable softmax over the (tiny) action dimension.
    m = jnp.max(logits, axis=-1, keepdims=True)
    e = jnp.exp(logits - m)
    denom = jnp.sum(e, axis=-1, keepdims=True)
    # Exact reciprocal keeps the 1e-5 tolerance; still off the VALU path (EUP).
    out_ref[...] = (e * pl.reciprocal(denom, approx=False)).astype(out_ref.dtype)


def _round_up(n, m):
    return ((n + m - 1) // m) * m


def _choose_tile(batch, tile_b):
    """Pick a batch tile: multiple of 8, big enough to amortize per-step
    overhead, small enough that the grid has >= 2 steps (v7x has 2 TCs)."""
    if batch <= 8:
        return batch                         # single full-dim block (always legal)
    tile_b = _round_up(max(tile_b, 8), 8)    # sublane (8,128) rule, defensively
    two_way = _round_up(-(-batch // 2), 8)   # ceil(batch/2) rounded up to 8
    return min(tile_b, two_way)


def actor_forward(x, w1, b1, w2, b2, *, tile_b=4096):
    """Fused Actor forward.  x: [batch, state_dim] f32 -> [batch, n_actions]."""
    batch, state_dim = x.shape
    hidden, n_actions = w2.shape

    tile_b = _choose_tile(batch, tile_b)
    grid = (pl.cdiv(batch, tile_b),)         # ragged last block handled by Pallas

    return pl.pallas_call(
        actor_kernel,
        grid=grid,
        in_specs=[
            # x: streamed per batch tile (double-buffered by the pipeline).
            # Block spans the full last dim -> one contiguous HBM read per step.
            pl.BlockSpec((tile_b, state_dim), lambda i: (i, 0)),
            # Weights/biases: constant index_map -> stay VMEM-resident.
            pl.BlockSpec(w1.shape, lambda i: (0, 0)),
            pl.BlockSpec(b1.shape, lambda i: (0, 0)),
            pl.BlockSpec(w2.shape, lambda i: (0, 0)),
            pl.BlockSpec(b2.shape, lambda i: (0, 0)),
        ],
        # Real-width output: masked store in-lane, but 64x less HBM writeback
        # than a 128-padded layout, and no post-kernel slice copy.
        out_specs=pl.BlockSpec((tile_b, n_actions), lambda i: (i, 0)),
        out_shape=jax.ShapeDtypeStruct((batch, n_actions), x.dtype),
        compiler_params=pltpu.CompilerParams(
            dimension_semantics=("parallel",),    # v7x: shard batch over 2 TCs
            vmem_limit_bytes=32 * 1024 * 1024,    # padded-lane footprint headroom
        ),
    )(x, w1, b1, w2, b2)


def init_actor_params(key, state_dim, hidden, n_actions, dtype=jnp.float32):
    # Deterministic init mimicking PyTorch Linear's uniform(-1/sqrt(fan_in), ...).
    k1, k2, k3, k4 = jax.random.split(key, 4)
    lim1 = 1.0 / jnp.sqrt(jnp.array(state_dim, dtype))
    lim2 = 1.0 / jnp.sqrt(jnp.array(hidden, dtype))
    w1 = jax.random.uniform(k1, (state_dim, hidden), dtype, -lim1, lim1)
    b1 = jax.random.uniform(k2, (1, hidden), dtype, -lim1, lim1)
    w2 = jax.random.uniform(k3, (hidden, n_actions), dtype, -lim2, lim2)
    b2 = jax.random.uniform(k4, (1, n_actions), dtype, -lim2, lim2)
    return w1, b1, w2, b2


def actor_reference(x, w1, b1, w2, b2):
    h = jnp.tanh(x @ w1 + b1)
    logits = h @ w2 + b2
    return jax.nn.softmax(logits, axis=-1)


if __name__ == "__main__":
    # CartPole-v1: state_dim = 4, n_actions = 2.
    state_dim, hidden, n_actions = 4, 64, 2

    key = jax.random.PRNGKey(0)
    kx, kp = jax.random.split(key)
    w1, b1, w2, b2 = init_actor_params(kp, state_dim, hidden, n_actions)

    # Case 1: default (perf) config.  batch=200 -> tile_b clamps to 104 so the
    # grid has 2 steps (both v7x TCs busy) and the last block is ragged (96 rows),
    # exercising Pallas's masked partial-block read/write path.
    x = jax.random.normal(kx, (200, state_dim), jnp.float32)
    out = jax.block_until_ready(actor_forward(x, w1, b1, w2, b2))
    ref = actor_reference(x, w1, b1, w2, b2)
    assert out.shape == (200, n_actions)
    assert jnp.allclose(out, ref, atol=1e-5, rtol=1e-5), "mismatch vs reference (batch=200)"
    assert jnp.allclose(jnp.sum(out, axis=-1), 1.0, atol=1e-5), "softmax rows must sum to 1"

    # Case 2: explicit small tile (correctness-only; NOT the perf config) to
    # exercise a multi-step grid with a ragged trailing block (3 steps: 64,64,72->ragged).
    out_multi = jax.block_until_ready(actor_forward(x, w1, b1, w2, b2, tile_b=64))
    assert jnp.allclose(out_multi, ref, atol=1e-5, rtol=1e-5), "mismatch vs reference (tile_b=64)"

    # Case 3: tiny inference batch (single full-dim block) through the same path.
    x_small = jax.random.normal(kx, (8, state_dim), jnp.float32)
    out_s = jax.block_until_ready(actor_forward(x_small, w1, b1, w2, b2))
    ref_s = actor_reference(x_small, w1, b1, w2, b2)
    assert out_s.shape == (8, n_actions)
    assert jnp.allclose(out_s, ref_s, atol=1e-5, rtol=1e-5), "mismatch vs reference (batch=8)"
    assert jnp.allclose(jnp.sum(out_s, axis=-1), 1.0, atol=1e-5), "softmax rows must sum to 1"

    print("KERNEL_OK")
</pallas_src>

<mosaic_0001>
module attributes {stable_mosaic.version = 11 : i64} {
  func.func @actor_kernel(%arg0: i32, %arg1: memref<104x4xf32, #tpu.memory_space<vmem>>, %arg2: memref<4x64xf32, #tpu.memory_space<vmem>>, %arg3: memref<1x64xf32, #tpu.memory_space<vmem>>, %arg4: memref<64x2xf32, #tpu.memory_space<vmem>>, %arg5: memref<1x2xf32, #tpu.memory_space<vmem>>, %arg6: memref<104x2xf32, #tpu.memory_space<vmem>>) attributes {dimension_semantics = [#tpu.dimension_semantics<parallel>], iteration_bounds = array<i64: 2>, scalar_prefetch = 0 : i64, scratch_operands = 0 : i64, tpu.core_type = #tpu.core_type<tc>, window_params = [{transform_indices = @transform_0, window_bounds = array<i64: 104, 4>}, {pipeline_mode = #tpu.pipeline_mode<synchronous>, transform_indices = @transform_1, window_bounds = array<i64: 4, 64>}, {pipeline_mode = #tpu.pipeline_mode<synchronous>, transform_indices = @transform_2, window_bounds = array<i64: 1, 64>}, {pipeline_mode = #tpu.pipeline_mode<synchronous>, transform_indices = @transform_3, window_bounds = array<i64: 64, 2>}, {pipeline_mode = #tpu.pipeline_mode<synchronous>, transform_indices = @transform_4, window_bounds = array<i64: 1, 2>}, {transform_indices = @transform_5, window_bounds = array<i64: 104, 2>}]} {
    %c0 = arith.constant 0 : index
    %c0_0 = arith.constant 0 : index
    %0 = vector.load %arg1[%c0, %c0_0] : memref<104x4xf32, #tpu.memory_space<vmem>>, vector<104x4xf32>
    %c0_1 = arith.constant 0 : index
    %c0_2 = arith.constant 0 : index
    %1 = vector.load %arg2[%c0_1, %c0_2] : memref<4x64xf32, #tpu.memory_space<vmem>>, vector<4x64xf32>
    %cst = arith.constant dense<0.000000e+00> : vector<104x64xf32>
    %2 = tpu.matmul %0, %1, %cst {dimension_numbers = #tpu.dot_dimension_numbers<[1], [0], [0], [1], [0, 0, 1, 1], [], []>} : vector<104x4xf32>, vector<4x64xf32>, vector<104x64xf32> -> vector<104x64xf32>
    %c0_3 = arith.constant 0 : index
    %c0_4 = arith.constant 0 : index
    %3 = vector.load %arg3[%c0_3, %c0_4] : memref<1x64xf32, #tpu.memory_space<vmem>>, vector<1x64xf32>
    %4 = vector.broadcast %3 : vector<1x64xf32> to vector<104x64xf32>
    %5 = arith.addf %2, %4 : vector<104x64xf32>
    %6 = math.tanh %5 : vector<104x64xf32>
    %c0_5 = arith.constant 0 : index
    %c0_6 = arith.constant 0 : index
    %7 = vector.load %arg4[%c0_5, %c0_6] : memref<64x2xf32, #tpu.memory_space<vmem>>, vector<64x2xf32>
    %cst_7 = arith.constant dense<0.000000e+00> : vector<104x2xf32>
    %8 = tpu.matmul %6, %7, %cst_7 {dimension_numbers = #tpu.dot_dimension_numbers<[1], [0], [0], [1], [0, 0, 1, 1], [], []>} : vector<104x64xf32>, vector<64x2xf32>, vector<104x2xf32> -> vector<104x2xf32>
    %c0_8 = arith.constant 0 : index
    %c0_9 = arith.constant 0 : index
    %9 = vector.load %arg5[%c0_8, %c0_9] : memref<1x2xf32, #tpu.memory_space<vmem>>, vector<1x2xf32>
    %10 = vector.broadcast %9 : vector<1x2xf32> to vector<104x2xf32>
    %11 = arith.addf %8, %10 : vector<104x2xf32>
    %cst_10 = arith.constant dense<0xFF800000> : vector<104xf32>
    %12 = vector.multi_reduction <maximumf>, %11, %cst_10 [1] : vector<104x2xf32> to vector<104xf32>
    %13 = vector.shape_cast %12 : vector<104xf32> to vector<104x1xf32>
    %14 = vector.broadcast %13 : vector<104x1xf32> to vector<104x2xf32>
    %15 = arith.subf %11, %14 : vector<104x2xf32>
    %16 = math.exp %15 : vector<104x2xf32>
    %cst_11 = arith.constant dense<0.000000e+00> : vector<104xf32>
    %17 = vector.multi_reduction <add>, %16, %cst_11 [1] : vector<104x2xf32> to vector<104xf32>
    %18 = vector.shape_cast %17 : vector<104xf32> to vector<104x1xf32>
    %19 = tpu.reciprocal %18 : vector<104x1xf32> -> vector<104x1xf32>
    %20 = vector.broadcast %19 : vector<104x1xf32> to vector<104x2xf32>
    %21 = arith.mulf %16, %20 : vector<104x2xf32>
    %c0_12 = arith.constant 0 : index
    %c0_13 = arith.constant 0 : index
    %22 = vector.load %arg6[%c0_12, %c0_13] : memref<104x2xf32, #tpu.memory_space<vmem>>, vector<104x2xf32>
    tpu.vector_store %arg6[%c0_12, %c0_13], %21 {strides = array<i32>} : memref<104x2xf32, #tpu.memory_space<vmem>>, vector<104x2xf32>,
    return
  }
  func.func @transform_0(%arg0: i32) -> (i32, i32) {
    %c0_i32 = arith.constant 0 : i32
    %c0_i32_0 = arith.constant 0 : i32
    return %arg0, %c0_i32 : i32, i32
  }
  func.func @transform_1(%arg0: i32) -> (i32, i32) {
    %c0_i32 = arith.constant 0 : i32
    %c0_i32_0 = arith.constant 0 : i32
    %c0_i32_1 = arith.constant 0 : i32
    return %c0_i32, %c0_i32_0 : i32, i32
  }
  func.func @transform_2(%arg0: i32) -> (i32, i32) {
    %c0_i32 = arith.constant 0 : i32
    %c0_i32_0 = arith.constant 0 : i32
    %c0_i32_1 = arith.constant 0 : i32
    return %c0_i32, %c0_i32_0 : i32, i32
  }
  func.func @transform_3(%arg0: i32) -> (i32, i32) {
    %c0_i32 = arith.constant 0 : i32
    %c0_i32_0 = arith.constant 0 : i32
    %c0_i32_1 = arith.constant 0 : i32
    return %c0_i32, %c0_i32_0 : i32, i32
  }
  func.func @transform_4(%arg0: i32) -> (i32, i32) {
    %c0_i32 = arith.constant 0 : i32
    %c0_i32_0 = arith.constant 0 : i32
    %c0_i32_1 = arith.constant 0 : i32
    return %c0_i32, %c0_i32_0 : i32, i32
  }
  func.func @transform_5(%arg0: i32) -> (i32, i32) {
    %c0_i32 = arith.constant 0 : i32
    %c0_i32_0 = arith.constant 0 : i32
    return %arg0, %c0_i32 : i32, i32
  }
}

</mosaic_0001>

<bundles_post_ra>
// kernel: tpu_custom_call.1
= control target key start
LH: loop header
LB: loop body
LE: loop exit
PB: predicated region body
PF: predicated region fallthrough
CT: control target
= control target key end

     0   :  { %s1555_s18 = smov 0   ;;  %s1557_s19 = smov 0   ;;  %s2005_s0 = inlined_call_operand.vmem [shape: f32[200,4], index: 0, kind: input, shape index: {}]   ;;  %s2006_s1 = inlined_call_operand.vmem [shape: f32[4,64], index: 1, kind: input, shape index: {}]   ;;  %s2007_s2 = inlined_call_operand.vmem [shape: f32[1,64], index: 2, kind: input, shape index: {}]   ;;  %s2008_s3 = inlined_call_operand.vmem [shape: f32[64,2], index: 3, kind: input, shape index: {}]   ;;  %s2009_s4 = inlined_call_operand.vmem [shape: f32[1,2], index: 4, kind: input, shape index: {}]   ;;  %s2010_s5 = inlined_call_operand.vmem [shape: f32[200,2], index: 5, kind: output, shape index: {}]  }
   0x1   :  { %s1559_s20 = smov 0  }
   0x2 LB: > { %s1568_s21 = sadd.s32 4294967295, %s1488_s20   ;;  %s1570_s22 = sadd.s32 1, %s1488_s20   ;;  %s1488_s20 = sphi %s1559_s20, %s2017_s20   ;;  %s1484_s19 = sphi %s1557_s19, %s2016_s19   ;;  %s1480_s18 = sphi %s1555_s18, %s2015_s18  }
   0x3   : > { %s129_s23 = ssub.s32 %s1488_s20, %s1570_s22  ;;  %s132_s24 = sadd.s32 1, %s1484_s19 }
   0x4   : > { %p130_p0 = scmp.eq.s32.totalorder %s129_s23, 0  ;;  %p142_p1 = scmp.ne.s32.totalorder %s1484_s19, %s1480_s18 }
   0x5   : > { %p143_p2 = scmp.eq.s32.totalorder %s1568_s21, 1  ;;  %p1064_p3 = scmp.ge.s32.totalorder %s1488_s20, 1 }
   0x6   : > { %s1578_s25 = scalar_select %p130_p0, %s1484_s19, %s132_s24  }
   0x7   : > { %p1580_p4 = por %p143_p2, %p142_p1  ;;  %p196_p5 = scmp.lt.s32.totalorder %s1488_s20, 3 }
   0x9   : > { %p197_p6 = pnand %p1064_p3, %p196_p5 }
   0xa   : > { %v259_v0 = vld [vmem:[%s2006_s1] sm:$0xf] (!%p197_p6)  ;;  %vm307_vm0 = vcmask (!%p197_p6), 1043456   ;;  %s1588_s29 = smul.u32 (!%p197_p6), 13, %s1568_s21  ;;  %v1522_v1 = vmov (!%p197_p6), 0.0   ;;  %vm1523_vm1 = vmmov (!%p197_p6), 0  }
   0xb   : > { %200 = sbr.rel (%p197_p6) target bundleno = 886 (0x376), region = 40  ;;  %1143 = vmatprep.subr.mxu0 (!%p197_p6), %v1522_v1  ;;  %1145 = vmatprep.mubr.msk.f32.mxu0 (!%p197_p6), %vm1523_vm1, %v1522_v1  ;;  %v454_v2 = vld [vmem:[%s2008_s3] sm:$0xff] (!%p197_p6)  ;;  %v455_v3 = vld [vmem:[%s2008_s3 + $0x8] sm:$0xff] (!%p197_p6)  ;;  %v1524_v5 = vmov (!%p197_p6), 0.0|0.0   ;;  %v456_v6 = vld [vmem:[%s2008_s3 + $0x10] sm:$0xff] (!%p197_p6)  ;;  %vm267_vm2 = vcmask (!%p197_p6), 31744  }
   0xc   : > { %1144 = vmatpush3.msk.msra.mxu0 (!%p197_p6), %vm307_vm0, %v259_v0  ;;  %p232_p7 = scmp.lt.s32.totalorder (!%p197_p6), %s1588_s29, 24  ;;  %v1240_v4 = vpack.c.bf16 (!%p197_p6), %v455_v3, %v454_v2  ;;  %1251 = vmatprep.subr.bf16.mxu1 (!%p197_p6), %v1524_v5  ;;  %v457_v7 = vld [vmem:[%s2008_s3 + $0x18] sm:$0xff] (!%p197_p6)  ;;  %v458_v22 = vld [vmem:[%s2008_s3 + $0x20] sm:$0xff] (!%p197_p6)  ;;  %v459_v23 = vld [vmem:[%s2008_s3 + $0x28] sm:$0xff] (!%p197_p6)  ;;  %vm469_vm3 = vcmask (!%p197_p6), 523264   ;;  %vm639_vm4 = vcmask (!%p197_p6), 15360  }
   0xd   : > { %1239 = vmatprep.subr.bf16.mxu0 (!%p197_p6), %v1524_v5  ;;  %1203 = vmatprep.mubr.msk.f32.mxu1 (!%p197_p6), %vm1523_vm1, %v1522_v1  ;;  %v1243_v8 = vpack.c.bf16 (!%p197_p6), %v457_v7, %v456_v6  ;;  %v1246_v24 = vpack.c.bf16 (!%p197_p6), %v459_v23, %v458_v22  ;;  %v460_v25 = vld [vmem:[%s2008_s3 + $0x30] sm:$0xff] (!%p197_p6)  ;;  %v461_v26 = vld [vmem:[%s2008_s3 + $0x38] sm:$0xff] (!%p197_p6)  ;;  %v1689_v28 = vld [vmem:[%s2007_s2] ss:$0 sm:$0xff] (!%p197_p6)  ;;  %s224_s12 = sand.u32 (!%p197_p6), 1, %s1480_s18  }
   0xe   : > { %1255 = vmatpush3.bf16.msra.mxu1 (!%p197_p6), %v1240_v4  ;;  %v1249_v27 = vpack.c.bf16 (!%p197_p6), %v461_v26, %v460_v25 }
   0xf   : > { %1252 = vmatprep.subr.bf16.mxu1 (!%p197_p6), %v1524_v5 }
  0x12   : > { %s233_s13 = scalar_select %p232_p7, %s1588_s29, 24  ;;  %1256 = vmatpush3.bf16.msra.mxu1 %v1243_v8 }
  0x13   : > { %1253 = vmatprep.subr.bf16.mxu1 %v1524_v5  ;;  %s804_s18 = ssub.s32 (%p1580_p4), 25, %s1588_s29  ;;  %s1107_s15 = smul.u32 (%p1580_p4), 104, %s1568_s21 }
  0x14   : > { %s1065_s14 = sshll.u32 %s233_s13, 3  ;;  %s1259_s13 = smul.u32 104, %s224_s12 }
  0x15   : > { %s1615_s17 = scalar_lea.vmem %s2005_s0, %s1065_s14  ;;  %p805_p8 = scmp.lt.s32.totalorder (%p1580_p4), %s804_s18, 13 }
  0x16   : > { %v246_v9 = vld [vmem:[%s1615_s17] sm:$0xff]  ;;  %v247_v10 = vld [vmem:[%s1615_s17 + $0x8] sm:$0xff]  ;;  %v248_v11 = vld [vmem:[%s1615_s17 + $0x10] sm:$0xff]  ;;  %1257 = vmatpush3.bf16.msra.mxu1 %v1246_v24  ;;  %s1876_s14 = scalar_lea.vmem [#allocation2], %s1259_s13   ;;  %s1923_s20 = scalar_lea.vmem (%p1580_p4), %s2010_s5, %s1107_s15  }
  0x17   : > { %1146 = vmatmul.mubr.msk.f32.vlgmr.msra.gmra.mrb[0].mxu0 %vm267_vm2, %v246_v9  ;;  %v249_v12 = vld [vmem:[%s1615_s17 + $0x18] sm:$0xff]  ;;  %v250_v13 = vld [vmem:[%s1615_s17 + $0x20] sm:$0xff]  ;;  %v251_v14 = vld [vmem:[%s1615_s17 + $0x28] sm:$0xff]  ;;  %1254 = vmatprep.subr.bf16.mxu1 %v1524_v5 }
  0x18   : > { %1148 = vmatprep.mubr.msk.f32.mxu0 %vm1523_vm1, %v1522_v1  ;;  %1241 = vmatpush3.bf16.msra.mxu0 %v1240_v4  ;;  %v252_v15 = vld [vmem:[%s1615_s17 + $0x30] sm:$0xff]  ;;  %v253_v16 = vld [vmem:[%s1615_s17 + $0x38] sm:$0xff]  ;;  %v254_v17 = vld [vmem:[%s1615_s17 + $0x40] sm:$0xff] }
  0x19   : > { %1242 = vmatprep.subr.bf16.mxu0 %v1524_v5  ;;  %v255_v18 = vld [vmem:[%s1615_s17 + $0x48] sm:$0xff]  ;;  %v256_v19 = vld [vmem:[%s1615_s17 + $0x50] sm:$0xff]  ;;  %v257_v20 = vld [vmem:[%s1615_s17 + $0x58] sm:$0xff] }
  0x1a   : > { %v258_v21 = vld [vmem:[%s1615_s17 + $0x60] sm:$0xff]  ;;  %1258 = vmatpush3.bf16.msra.mxu1 %v1249_v27 }
  0x1b   : > { %1149 = vmatmul.mubr.msk.f32.gmra.mrb[2].mxu0 %vm267_vm2, %v247_v10 }
  0x1c   : > { %1151 = vmatprep.mubr.msk.f32.mxu0 %vm1523_vm1, %v1522_v1  ;;  %1244 = vmatpush3.bf16.msra.mxu0 %v1243_v8 }
  0x1d   : > { %1245 = vmatprep.subr.bf16.mxu0 %v1524_v5 }
  0x1f   : > { %1152 = vmatmul.mubr.msk.f32.gmra.mrb[4].mxu0 %vm267_vm2, %v248_v11 }
  0x20   : > { %1154 = vmatprep.mubr.msk.f32.mxu0 %vm1523_vm1, %v1522_v1  ;;  %1247 = vmatpush3.bf16.msra.mxu0 %v1246_v24 }
  0x21   : > { %1248 = vmatprep.subr.bf16.mxu0 %v1524_v5 }
  0x23   : > { %1155 = vmatmul.mubr.msk.f32.gmra.mrb[6].mxu0 %vm267_vm2, %v249_v12 }
  0x24   : > { %1157 = vmatprep.mubr.msk.f32.mxu0 %vm1523_vm1, %v1522_v1  ;;  %1250 = vmatpush3.bf16.msra.mxu0 %v1249_v27 }
  0x27   : > { %1158 = vmatmul.mubr.msk.f32.gmra.mrb[8].mxu0 %vm267_vm2, %v250_v13 }
  0x28   : > { %1160 = vmatprep.mubr.msk.f32.mxu0 %vm1523_vm1, %v1522_v1 }
  0x2b   : > { %1161 = vmatmul.mubr.msk.f32.gmra.mrb[10].mxu0 %vm267_vm2, %v251_v14 }
  0x2c   : > { %1163 = vmatprep.mubr.msk.f32.mxu0 %vm1523_vm1, %v1522_v1 }
  0x2f   : > { %1164 = vmatmul.mubr.msk.f32.gmra.mrb[12].mxu0 %vm267_vm2, %v252_v15 }
  0x30   : > { %1166 = vmatprep.mubr.msk.f32.mxu0 %vm1523_vm1, %v1522_v1 }
  0x33   : > { %1167 = vmatmul.mubr.msk.f32.gmra.mrb[14].mxu0 %vm267_vm2, %v253_v16 }
  0x34   : > { %1169 = vmatprep.mubr.msk.f32.mxu0 %vm1523_vm1, %v1522_v1 }
  0x37   : > { %1170 = vmatmul.mubr.msk.f32.gmra.mrb[16].mxu0 %vm267_vm2, %v254_v17 }
  0x38   : > { %1172 = vmatprep.mubr.msk.f32.mxu0 %vm1523_vm1, %v1522_v1 }
  0x3b   : > { %1173 = vmatmul.mubr.msk.f32.gmra.mrb[18].mxu0 %vm267_vm2, %v255_v18  ;;  %v1742_v18 = vld [vmem:[%s2009_s4] ss:$0 sm:$0xff] }
  0x3c   : > { %1175 = vmatprep.mubr.msk.f32.mxu0 %vm1523_vm1, %v1522_v1 }
  0x3f   : > { %1176 = vmatmul.mubr.msk.f32.gmra.mrb[20].mxu0 %vm267_vm2, %v256_v19 }
  0x40   : > { %1178 = vmatprep.mubr.msk.f32.mxu0 %vm1523_vm1, %v1522_v1 }
  0x43   : > { %1179 = vmatmul.mubr.msk.f32.gmra.mrb[22].mxu0 %vm267_vm2, %v257_v20 }
  0x44   : > { %1181 = vmatprep.mubr.msk.f32.mxu0 %vm1523_vm1, %v1522_v1 }
  0x47   : > { %1182 = vmatmul.mubr.msk.f32.gmra.mrb[24].mxu0 %vm267_vm2, %v258_v21 }
  0x48   : > { %1200 = vmatprep.mubr.msk.f32.mxu0 %vm1523_vm1, %v1522_v1 }
  0xea   : > { %v377_v29 = vpop.f32.mrb[0].mxu0 }
  0xeb   : > { %v378_v30 = vadd.f32 %v1689_v28, %v377_v29  ;;  %v1147_v31 = vpop.f32.mrb[1].mxu0 }
  0xed   : > { %1352 = vtanh.f32 %v378_v30 }
  0xee   : > { %v382_v32 = vpop.f32.mrb[2].mxu0 }
  0xef   : > { %v383_v33 = vadd.f32 %v1689_v28, %v382_v32  ;;  %v1150_v34 = vpop.f32.mrb[3].mxu0 }
  0xf1   : > { %1354 = vtanh.f32 %v383_v33 }
  0xf2   : > { %v387_v35 = vpop.f32.mrb[4].mxu0 }
  0xf3   : > { %v388_v36 = vadd.f32 %v1689_v28, %v387_v35  ;;  %v1153_v37 = vpop.f32.mrb[5].mxu0 }
  0xf5   : > { %1356 = vtanh.f32 %v388_v36 }
  0xf6   : > { %v392_v38 = vpop.f32.mrb[6].mxu0 }
  0xf7   : > { %v1353_v39 = vpop.eup %1352  ;;  %v393_v40 = vadd.f32 %v1689_v28, %v392_v38  ;;  %v1156_v41 = vpop.f32.mrb[7].mxu0 }
  0xf8   : > { %1201 = vmatmul.mubr.msk.f32.vlgmr.msra.gmra.mrb[26].mxu0 %vm469_vm3, %v1353_v39 }
  0xf9   : > { %1358 = vtanh.f32 %v393_v40 }
  0xfa   : > { %v397_v42 = vpop.f32.mrb[8].mxu0 }
  0xfb   : > { %v1355_v43 = vpop.eup %1354  ;;  %v398_v44 = vadd.f32 %v1689_v28, %v397_v42  ;;  %v1159_v45 = vpop.f32.mrb[9].mxu0 }
  0xfc   : > { %1204 = vmatmul.mubr.msk.f32.vlgmr.msra.gmra.mrb[0].mxu1 %vm469_vm3, %v1355_v43 }
  0xfd   : > { %1360 = vtanh.f32 %v398_v44  ;;  %1206 = vmatprep.mubr.msk.f32.mxu1 %vm1523_vm1, %v1522_v1 }
  0xfe   : > { %v402_v46 = vpop.f32.mrb[10].mxu0 }
  0xff   : > { %v1357_v47 = vpop.eup %1356  ;;  %v403_v48 = vadd.f32 %v1689_v28, %v402_v46  ;;  %v1162_v49 = vpop.f32.mrb[11].mxu0 }
 0x100   : > { %1207 = vmatmul.mubr.msk.f32.gmra.mrb[2].mxu1 %vm469_vm3, %v1357_v47 }
 0x101   : > { %1362 = vtanh.f32 %v403_v48  ;;  %1209 = vmatprep.mubr.msk.f32.mxu1 %vm1523_vm1, %v1522_v1 }
 0x102   : > { %v407_v50 = vpop.f32.mrb[12].mxu0 }
 0x103   : > { %v1359_v51 = vpop.eup %1358  ;;  %v408_v52 = vadd.f32 %v1689_v28, %v407_v50  ;;  %v1165_v53 = vpop.f32.mrb[13].mxu0 }
 0x104   : > { %1210 = vmatmul.mubr.msk.f32.gmra.mrb[4].mxu1 %vm469_vm3, %v1359_v51 }
 0x105   : > { %1364 = vtanh.f32 %v408_v52  ;;  %1212 = vmatprep.mubr.msk.f32.mxu1 %vm1523_vm1, %v1522_v1 }
 0x106   : > { %v412_v54 = vpop.f32.mrb[14].mxu0 }
 0x107   : > { %v1361_v55 = vpop.eup %1360  ;;  %v413_v56 = vadd.f32 %v1689_v28, %v412_v54  ;;  %v1168_v57 = vpop.f32.mrb[15].mxu0 }
 0x108   : > { %1213 = vmatmul.mubr.msk.f32.gmra.mrb[6].mxu1 %vm469_vm3, %v1361_v55 }
 0x109   : > { %1366 = vtanh.f32 %v413_v56  ;;  %1215 = vmatprep.mubr.msk.f32.mxu1 %vm1523_vm1, %v1522_v1 }
 0x10a   : > { %v417_v58 = vpop.f32.mrb[16].mxu0 }
 0x10b   : > { %v1363_v59 = vpop.eup %1362  ;;  %v418_v60 = vadd.f32 %v1689_v28, %v417_v58  ;;  %v1171_v61 = vpop.f32.mrb[17].mxu0 }
 0x10c   : > { %1216 = vmatmul.mubr.msk.f32.gmra.mrb[8].mxu1 %vm469_vm3, %v1363_v59 }
 0x10d   : > { %1368 = vtanh.f32 %v418_v60  ;;  %1218 = vmatprep.mubr.msk.f32.mxu1 %vm1523_vm1, %v1522_v1 }
 0x10e   : > { %v422_v62 = vpop.f32.mrb[18].mxu0 }
 0x10f   : > { %v1365_v63 = vpop.eup %1364  ;;  %v423_v0 = vadd.f32 %v1689_v28, %v422_v62  ;;  %v1174_v2 = vpop.f32.mrb[19].mxu0 }
 0x110   : > { %1219 = vmatmul.mubr.msk.f32.gmra.mrb[10].mxu1 %vm469_vm3, %v1365_v63 }
 0x111   : > { %1370 = vtanh.f32 %v423_v0  ;;  %1221 = vmatprep.mubr.msk.f32.mxu1 %vm1523_vm1, %v1522_v1 }
 0x112   : > { %v427_v3 = vpop.f32.mrb[20].mxu0 }
 0x113   : > { %v1367_v4 = vpop.eup %1366  ;;  %v428_v5 = vadd.f32 %v1689_v28, %v427_v3  ;;  %v1177_v6 = vpop.f32.mrb[21].mxu0 }
 0x114   : > { %1222 = vmatmul.mubr.msk.f32.gmra.mrb[12].mxu1 %vm469_vm3, %v1367_v4 }
 0x115   : > { %1372 = vtanh.f32 %v428_v5  ;;  %1224 = vmatprep.mubr.msk.f32.mxu1 %vm1523_vm1, %v1522_v1 }
 0x116   : > { %v432_v7 = vpop.f32.mrb[22].mxu0 }
 0x117   : > { %v1369_v8 = vpop.eup %1368  ;;  %v433_v9 = vadd.f32 %v1689_v28, %v432_v7  ;;  %v1180_v10 = vpop.f32.mrb[23].mxu0 }
 0x118   : > { %1225 = vmatmul.mubr.msk.f32.gmra.mrb[14].mxu1 %vm469_vm3, %v1369_v8 }
 0x119   : > { %1374 = vtanh.f32 %v433_v9  ;;  %1227 = vmatprep.mubr.msk.f32.mxu1 %vm1523_vm1, %v1522_v1 }
 0x11a   : > { %v437_v11 = vpop.f32.mrb[24].mxu0 }
 0x11b   : > { %v1371_v12 = vpop.eup %1370  ;;  %v438_v13 = vadd.f32 %v1689_v28, %v437_v11  ;;  %v1183_v14 = vpop.f32.mrb[25].mxu0 }
 0x11c   : > { %1228 = vmatmul.mubr.msk.f32.gmra.mrb[16].mxu1 %vm469_vm3, %v1371_v12 }
 0x11d   : > { %1376 = vtanh.f32 %v438_v13  ;;  %1230 = vmatprep.mubr.msk.f32.mxu1 %vm1523_vm1, %v1522_v1 }
 0x11f   : > { %v1373_v15 = vpop.eup %1372 }
 0x120   : > { %1231 = vmatmul.mubr.msk.f32.gmra.mrb[18].mxu1 %vm469_vm3, %v1373_v15 }
 0x121   : > { %1233 = vmatprep.mubr.msk.f32.mxu1 %vm1523_vm1, %v1522_v1 }
 0x123   : > { %v1375_v16 = vpop.eup %1374 }
 0x124   : > { %1234 = vmatmul.mubr.msk.f32.gmra.mrb[20].mxu1 %vm469_vm3, %v1375_v16 }
 0x125   : > { %1236 = vmatprep.mubr.msk.f32.mxu1 %vm1523_vm1, %v1522_v1 }
 0x127   : > { %v1377_v17 = vpop.eup %1376 }
 0x128   : > { %1237 = vmatmul.mubr.msk.f32.gmra.mrb[22].mxu1 %vm469_vm3, %v1377_v17 }
 0x1cb   : > { %v575_v19 = vpop.f32.mrb[26].mxu0 }
 0x1cc   : > { %v1745_v20 = vadd.f32 %v1742_v18, %v575_v19  ;;  %v1202_v21 = vpop.f32.mrb[27].mxu0 }
 0x1ce   : > { %v640_v22 = vsel %vm639_vm4, %v1745_v20, -inf }
 0x1cf   : > { %v580_v23 = vpop.f32.mrb[0].mxu1  ;;  %641 = vmax.xlane.f32.xlu0 %v640_v22 }
 0x1d0   : > { %v1750_v1 = vadd.f32 %v1742_v18, %v580_v23  ;;  %v1205_v24 = vpop.f32.mrb[1].mxu1 }
 0x1d2   : > { %v643_v25 = vsel %vm639_vm4, %v1750_v1, -inf }
 0x1d3   : > { %v585_v26 = vpop.f32.mrb[2].mxu1  ;;  %644 = vmax.xlane.f32.xlu0 %v643_v25 }
 0x1d4   : > { %v1755_v27 = vadd.f32 %v1742_v18, %v585_v26  ;;  %v1208_v28 = vpop.f32.mrb[3].mxu1 }
 0x1d6   : > { %v646_v29 = vsel %vm639_vm4, %v1755_v27, -inf }
 0x1d7   : > { %647 = vmax.xlane.f32.xlu1 %v646_v29  ;;  %v590_v30 = vpop.f32.mrb[4].mxu1 }
 0x1d8   : > { %v1760_v31 = vadd.f32 %v1742_v18, %v590_v30  ;;  %v1211_v32 = vpop.f32.mrb[5].mxu1 }
 0x1da   : > { %v649_v33 = vsel %vm639_vm4, %v1760_v31, -inf }
 0x1db   : > { %650 = vmax.xlane.f32.xlu1 %v649_v33  ;;  %v595_v34 = vpop.f32.mrb[6].mxu1 }
 0x1dc   : > { %v1765_v35 = vadd.f32 %v1742_v18, %v595_v34  ;;  %v1214_v36 = vpop.f32.mrb[7].mxu1 }
 0x1de   : > { %v652_v37 = vsel %vm639_vm4, %v1765_v35, -inf }
 0x1df   : > { %v600_v38 = vpop.f32.mrb[8].mxu1  ;;  %653 = vmax.xlane.f32.xlu0 %v652_v37 }
 0x1e0   : > { %v1770_v39 = vadd.f32 %v1742_v18, %v600_v38  ;;  %v1217_v40 = vpop.f32.mrb[9].mxu1 }
 0x1e2   : > { %v655_v41 = vsel %vm639_vm4, %v1770_v39, -inf }
 0x1e3   : > { %656 = vmax.xlane.f32.xlu1 %v655_v41  ;;  %v605_v42 = vpop.f32.mrb[10].mxu1 }
 0x1e4   : > { %v1775_v43 = vadd.f32 %v1742_v18, %v605_v42  ;;  %v1220_v44 = vpop.f32.mrb[11].mxu1 }
 0x1e6   : > { %v658_v45 = vsel %vm639_vm4, %v1775_v43, -inf }
 0x1e7   : > { %v610_v46 = vpop.f32.mrb[12].mxu1  ;;  %659 = vmax.xlane.f32.xlu0 %v658_v45 }
 0x1e8   : > { %v1780_v47 = vadd.f32 %v1742_v18, %v610_v46  ;;  %v1223_v48 = vpop.f32.mrb[13].mxu1 }
 0x1ea   : > { %v661_v49 = vsel %vm639_vm4, %v1780_v47, -inf }
 0x1eb   : > { %662 = vmax.xlane.f32.xlu1 %v661_v49  ;;  %v615_v50 = vpop.f32.mrb[14].mxu1 }
 0x1ec   : > { %v1785_v51 = vadd.f32 %v1742_v18, %v615_v50  ;;  %v1226_v52 = vpop.f32.mrb[15].mxu1 }
 0x1ee   : > { %v664_v53 = vsel %vm639_vm4, %v1785_v51, -inf }
 0x1ef   : > { %v620_v54 = vpop.f32.mrb[16].mxu1  ;;  %665 = vmax.xlane.f32.xlu0 %v664_v53 }
 0x1f0   : > { %v1790_v55 = vadd.f32 %v1742_v18, %v620_v54  ;;  %v1229_v56 = vpop.f32.mrb[17].mxu1 }
 0x1f2   : > { %v667_v57 = vsel %vm639_vm4, %v1790_v55, -inf }
 0x1f3   : > { %668 = vmax.xlane.f32.xlu1 %v667_v57  ;;  %v625_v58 = vpop.f32.mrb[18].mxu1 }
 0x1f4   : > { %v1795_v59 = vadd.f32 %v1742_v18, %v625_v58  ;;  %v1232_v60 = vpop.f32.mrb[19].mxu1 }
 0x1f6   : > { %v670_v61 = vsel %vm639_vm4, %v1795_v59, -inf }
 0x1f7   : > { %v630_v62 = vpop.f32.mrb[20].mxu1  ;;  %671 = vmax.xlane.f32.xlu0 %v670_v61 }
 0x1f8   : > { %v1800_v63 = vadd.f32 %v1742_v18, %v630_v62  ;;  %v1235_v0 = vpop.f32.mrb[21].mxu1 }
 0x1fa   : > { %v673_v2 = vsel %vm639_vm4, %v1800_v63, -inf }
 0x1fb   : > { %674 = vmax.xlane.f32.xlu1 %v673_v2  ;;  %v635_v3 = vpop.f32.mrb[22].mxu1 }
 0x1fc   : > { %v1805_v4 = vadd.f32 %v1742_v18, %v635_v3  ;;  %v1238_v5 = vpop.f32.mrb[23].mxu1 }
 0x1fe   : > { %v676_v6 = vsel %vm639_vm4, %v1805_v4, -inf }
 0x1ff   : > { %677 = vmax.xlane.f32.xlu0 %v676_v6 }
 0x25c   : > { %v642_v7 = vpop.xlane.xlu0 %641 }
 0x25d   : > { %v679_v8 = vsub.f32 %v1745_v20, %v642_v7 }
 0x25f   : > { %v692_v9 = vmul.f32 1.442695, %v679_v8 }
 0x260   : > { %v645_v10 = vpop.xlane.xlu0 %644 }
 0x261   : > { %1378 = vpow2.f32 %v692_v9  ;;  %v680_v11 = vsub.f32 %v1750_v1, %v645_v10 }
 0x263   : > { %v694_v12 = vmul.f32 1.442695, %v680_v11 }
 0x264   : > { %v648_v13 = vpop.xlane.xlu1 %647 }
 0x265   : > { %1380 = vpow2.f32 %v694_v12  ;;  %v681_v14 = vsub.f32 %v1755_v27, %v648_v13 }
 0x267   : > { %v696_v15 = vmul.f32 1.442695, %v681_v14 }
 0x268   : > { %v651_v16 = vpop.xlane.xlu1 %650 }
 0x269   : > { %1382 = vpow2.f32 %v696_v15  ;;  %v682_v17 = vsub.f32 %v1760_v31, %v651_v16 }
 0x26b   : > { %v1813_v18 = vpop.eup %1378  ;;  %v698_v19 = vmul.f32 1.442695, %v682_v17 }
 0x26c   : > { %v654_v21 = vpop.xlane.xlu0 %653  ;;  %v718_v20 = vsel %vm639_vm4, %v1813_v18, 0.0 }
 0x26d   : > { %1384 = vpow2.f32 %v698_v19  ;;  %v683_v22 = vsub.f32 %v1765_v35, %v654_v21  ;;  %719 = vadd.xlane.f32.xlu1 %v718_v20 }
 0x26f   : > { %v1818_v23 = vpop.eup %1380  ;;  %v700_v1 = vmul.f32 1.442695, %v683_v22 }
 0x270   : > { %v657_v24 = vpop.xlane.xlu1 %656  ;;  %v721_v25 = vsel %vm639_vm4, %v1818_v23, 0.0 }
 0x271   : > { %1386 = vpow2.f32 %v700_v1  ;;  %v684_v26 = vsub.f32 %v1770_v39, %v657_v24  ;;  %722 = vadd.xlane.f32.xlu0 %v721_v25 }
 0x273   : > { %v1823_v27 = vpop.eup %1382  ;;  %v702_v28 = vmul.f32 1.442695, %v684_v26 }
 0x274   : > { %v660_v29 = vpop.xlane.xlu0 %659  ;;  %v724_v30 = vsel %vm639_vm4, %v1823_v27, 0.0 }
 0x275   : > { %1388 = vpow2.f32 %v702_v28  ;;  %v685_v31 = vsub.f32 %v1775_v43, %v660_v29  ;;  %725 = vadd.xlane.f32.xlu1 %v724_v30 }
 0x277   : > { %v1828_v32 = vpop.eup %1384  ;;  %v704_v33 = vmul.f32 1.442695, %v685_v31 }
 0x278   : > { %v663_v34 = vpop.xlane.xlu1 %662  ;;  %v727_v35 = vsel %vm639_vm4, %v1828_v32, 0.0 }
 0x279   : > { %1390 = vpow2.f32 %v704_v33  ;;  %v686_v36 = vsub.f32 %v1780_v47, %v663_v34  ;;  %728 = vadd.xlane.f32.xlu0 %v727_v35 }
 0x27b   : > { %v1833_v37 = vpop.eup %1386  ;;  %v706_v38 = vmul.f32 1.442695, %v686_v36 }
 0x27c   : > { %v666_v39 = vpop.xlane.xlu0 %665  ;;  %v730_v40 = vsel %vm639_vm4, %v1833_v37, 0.0 }
 0x27d   : > { %1392 = vpow2.f32 %v706_v38  ;;  %v687_v41 = vsub.f32 %v1785_v51, %v666_v39  ;;  %731 = vadd.xlane.f32.xlu1 %v730_v40 }
 0x27f   : > { %v1838_v42 = vpop.eup %1388  ;;  %v708_v43 = vmul.f32 1.442695, %v687_v41 }
 0x280   : > { %v669_v44 = vpop.xlane.xlu1 %668  ;;  %v733_v45 = vsel %vm639_vm4, %v1838_v42, 0.0 }
 0x281   : > { %1394 = vpow2.f32 %v708_v43  ;;  %v688_v46 = vsub.f32 %v1790_v55, %v669_v44  ;;  %734 = vadd.xlane.f32.xlu0 %v733_v45 }
 0x283   : > { %v1843_v47 = vpop.eup %1390  ;;  %v710_v48 = vmul.f32 1.442695, %v688_v46 }
 0x284   : > { %v672_v49 = vpop.xlane.xlu0 %671  ;;  %v736_v50 = vsel %vm639_vm4, %v1843_v47, 0.0 }
 0x285   : > { %1396 = vpow2.f32 %v710_v48  ;;  %v689_v51 = vsub.f32 %v1795_v59, %v672_v49  ;;  %737 = vadd.xlane.f32.xlu1 %v736_v50 }
 0x287   : > { %v1848_v52 = vpop.eup %1392  ;;  %v712_v53 = vmul.f32 1.442695, %v689_v51 }
 0x288   : > { %v675_v54 = vpop.xlane.xlu1 %674  ;;  %v739_v56 = vsel %vm639_vm4, %v1848_v52, 0.0 }
 0x289   : > { %1398 = vpow2.f32 %v712_v53  ;;  %v690_v55 = vsub.f32 %v1800_v63, %v675_v54  ;;  %740 = vadd.xlane.f32.xlu0 %v739_v56 }
 0x28b   : > { %v1853_v57 = vpop.eup %1394  ;;  %v714_v58 = vmul.f32 1.442695, %v690_v55 }
 0x28c   : > { %v678_v60 = vpop.xlane.xlu0 %677  ;;  %v742_v61 = vsel %vm639_vm4, %v1853_v57, 0.0 }
 0x28d   : > { %1400 = vpow2.f32 %v714_v58  ;;  %v691_v59 = vsub.f32 %v1805_v4, %v678_v60  ;;  %743 = vadd.xlane.f32.xlu1 %v742_v61 }
 0x28f   : > { %v1858_v62 = vpop.eup %1396  ;;  %v716_v0 = vmul.f32 1.442695, %v691_v59 }
 0x290   : > { %v745_v2 = vsel %vm639_vm4, %v1858_v62, 0.0 }
 0x291   : > { %1402 = vpow2.f32 %v716_v0  ;;  %746 = vadd.xlane.f32.xlu0 %v745_v2 }
 0x293   : > { %v1862_v63 = vpop.eup %1398 }
 0x294   : > { %v748_v3 = vsel %vm639_vm4, %v1862_v63, 0.0 }
 0x295   : > { %749 = vadd.xlane.f32.xlu1 %v748_v3 }
 0x297   : > { %v1866_v5 = vpop.eup %1400 }
 0x298   : > { %v751_v4 = vsel %vm639_vm4, %v1866_v5, 0.0 }
 0x299   : > { %752 = vadd.xlane.f32.xlu0 %v751_v4 }
 0x29b   : > { %v1870_v6 = vpop.eup %1402 }
 0x29c   : > { %v754_v7 = vsel %vm639_vm4, %v1870_v6, 0.0 }
 0x29d   : > { %755 = vadd.xlane.f32.xlu1 %v754_v7 }
 0x2fa   : > { %v720_v8 = vpop.xlane.xlu1 %719 }
 0x2fb   : > { %1404 = vrcp.f32 %v720_v8 }
 0x2fe   : > { %v723_v9 = vpop.xlane.xlu0 %722 }
 0x2ff   : > { %1406 = vrcp.f32 %v723_v9 }
 0x302   : > { %v726_v10 = vpop.xlane.xlu1 %725 }
 0x303   : > { %1408 = vrcp.f32 %v726_v10 }
 0x305   : > { %v1405_v11 = vpop.eup %1404 }
 0x306   : > { %v770_v12 = vmul.f32 %v1405_v11, %v1813_v18  ;;  %v729_v13 = vpop.xlane.xlu0 %728 }
 0x307   : > { %1410 = vrcp.f32 %v729_v13 }
 0x308   : > { %783 = vst.msk [vmem:[%s1876_s14] sm:$0xff] %vm639_vm4, %v770_v12 }
 0x309   : > { %v1407_v14 = vpop.eup %1406 }
 0x30a   : > { %v771_v15 = vmul.f32 %v1407_v14, %v1818_v23  ;;  %v732_v16 = vpop.xlane.xlu1 %731 }
 0x30b   : > { %1412 = vrcp.f32 %v732_v16 }
 0x30c   : > { %784 = vst.msk [vmem:[%s1876_s14 + $0x8] sm:$0xff] %vm639_vm4, %v771_v15 }
 0x30d   : > { %v1409_v17 = vpop.eup %1408 }
 0x30e   : > { %v772_v18 = vmul.f32 %v1409_v17, %v1823_v27  ;;  %v735_v19 = vpop.xlane.xlu0 %734 }
 0x30f   : > { %1414 = vrcp.f32 %v735_v19 }
 0x310   : > { %785 = vst.msk [vmem:[%s1876_s14 + $0x10] sm:$0xff] %vm639_vm4, %v772_v18 }
 0x311   : > { %v1411_v21 = vpop.eup %1410 }
 0x312   : > { %v773_v20 = vmul.f32 %v1411_v21, %v1828_v32  ;;  %v738_v22 = vpop.xlane.xlu1 %737 }
 0x313   : > { %1416 = vrcp.f32 %v738_v22 }
 0x314   : > { %786 = vst.msk [vmem:[%s1876_s14 + $0x18] sm:$0xff] %vm639_vm4, %v773_v20 }
 0x315   : > { %v1413_v23 = vpop.eup %1412 }
 0x316   : > { %v774_v1 = vmul.f32 %v1413_v23, %v1833_v37  ;;  %v741_v24 = vpop.xlane.xlu0 %740 }
 0x317   : > { %1418 = vrcp.f32 %v741_v24 }
 0x318   : > { %787 = vst.msk [vmem:[%s1876_s14 + $0x20] sm:$0xff] %vm639_vm4, %v774_v1 }
 0x319   : > { %v1415_v25 = vpop.eup %1414 }
 0x31a   : > { %v775_v26 = vmul.f32 %v1415_v25, %v1838_v42  ;;  %v744_v27 = vpop.xlane.xlu1 %743 }
 0x31b   : > { %1420 = vrcp.f32 %v744_v27 }
 0x31c   : > { %788 = vst.msk [vmem:[%s1876_s14 + $0x28] sm:$0xff] %vm639_vm4, %v775_v26 }
 0x31d   : > { %v1417_v28 = vpop.eup %1416 }
 0x31e   : > { %v776_v29 = vmul.f32 %v1417_v28, %v1843_v47  ;;  %v747_v30 = vpop.xlane.xlu0 %746 }
 0x31f   : > { %1422 = vrcp.f32 %v747_v30 }
 0x320   : > { %789 = vst.msk [vmem:[%s1876_s14 + $0x30] sm:$0xff] %vm639_vm4, %v776_v29 }
 0x321   : > { %v1419_v31 = vpop.eup %1418 }
 0x322   : > { %v777_v32 = vmul.f32 %v1419_v31, %v1848_v52  ;;  %v750_v33 = vpop.xlane.xlu1 %749 }
 0x323   : > { %1424 = vrcp.f32 %v750_v33 }
 0x324   : > { %790 = vst.msk [vmem:[%s1876_s14 + $0x38] sm:$0xff] %vm639_vm4, %v777_v32 }
 0x325   : > { %v1421_v34 = vpop.eup %1420 }
 0x326   : > { %v778_v35 = vmul.f32 %v1421_v34, %v1853_v57  ;;  %v753_v36 = vpop.xlane.xlu0 %752 }
 0x327   : > { %1426 = vrcp.f32 %v753_v36 }
 0x328   : > { %791 = vst.msk [vmem:[%s1876_s14 + $0x40] sm:$0xff] %vm639_vm4, %v778_v35 }
 0x329   : > { %v1423_v37 = vpop.eup %1422 }
 0x32a   : > { %v779_v38 = vmul.f32 %v1423_v37, %v1858_v62  ;;  %v756_v39 = vpop.xlane.xlu1 %755 }
 0x32b   : > { %1428 = vrcp.f32 %v756_v39 }
 0x32c   : > { %792 = vst.msk [vmem:[%s1876_s14 + $0x48] sm:$0xff] %vm639_vm4, %v779_v38 }
 0x32d   : > { %v1425_v40 = vpop.eup %1424 }
 0x32e   : > { %v780_v41 = vmul.f32 %v1425_v40, %v1862_v63 }
 0x330   : > { %793 = vst.msk [vmem:[%s1876_s14 + $0x50] sm:$0xff] %vm639_vm4, %v780_v41 }
 0x331   : > { %v1427_v42 = vpop.eup %1426 }
 0x332   : > { %v781_v43 = vmul.f32 %v1427_v42, %v1866_v5  ;;  %802 = sbr.rel (!%p1580_p4) target bundleno = 886 (0x376), region = 44 }
 0x334   : > { %794 = vst.msk [vmem:[%s1876_s14 + $0x58] sm:$0xff] %vm639_vm4, %v781_v43 }
 0x335   : > { %v1429_v44 = vpop.eup %1428 }
 0x336   : > { %v782_v45 = vmul.f32 %v1429_v44, %v1870_v6 }
 0x338   : > { %795 = vst.msk [vmem:[%s1876_s14 + $0x60] sm:$0xff] %vm639_vm4, %v782_v45 }
 0x339   : > { %s2019_s18 = smov (!%p805_p8, %s804_s18), 13 }
 0x33a   : > { %s1095_s23 = sshll.u32 %s2019_s18, 7 }
 0x33b   : > { %p1098_p9 = scmp.eq.s32.totalorder %s1095_s23, 0 }
 0x33c   : > { %1430 = sdivrem.u32 (!%p1098_p9), %s2019_s18, 13 }
 0x33d   : > { %813 = sbr.rel (%p1098_p9) target bundleno = 886 (0x376), region = 48 }
 0x345   : > { %s1929_s26 = spop.drf %1430 }
 0x346   : > { %p1099_p10 = scmp.le.s32.totalorder %s1929_s26, 0 }
 0x347   : > { %s2012_s21 = smov (!%p1099_p10), %s1923_s20  ;;  %s2013_s29 = smov (!%p1099_p10), %s1876_s14 }
 0x348   : > { %1017 = sbr.rel (%p1099_p10) target bundleno = 857 (0x359), region = 124  ;;  %s1938_s24 = smov (!%p1099_p10), 0  }
 0x349   : > { %s1940_s27 = smov (!%p1099_p10), 0  }
 0x34f LB: >> { %v901_v46 = vld [vmem:[%s1496_s29] sm:$0xff]  ;;  %v903_v47 = vld [vmem:[%s1496_s29 + $0x8] sm:$0xff]  ;;  %v905_v48 = vld [vmem:[%s1496_s29 + $0x10] sm:$0xff]  ;;  %s927_s28 = sadd.s32 1, %s1500_s24  ;;  %s895_s27 = sadd.s32 1, %s1504_s27   ;;  %s1504_s27 = sphi %s1940_s27, %s895_s27   ;;  %s1500_s24 = sphi %s1938_s24, %s2014_s24   ;;  %s1496_s29 = sphi %s2013_s29, %s932_s29   ;;  %s1492_s21 = sphi %s2012_s21, %s933_s21  }
 0x350   : >> { %902 = vst [vmem:[%s1492_s21] sm:$0xff] %v901_v46  ;;  %904 = vst [vmem:[%s1492_s21 + $0x8] sm:$0xff] %v903_v47  ;;  %v907_v49 = vld [vmem:[%s1496_s29 + $0x18] sm:$0xff]  ;;  %v909_v50 = vld [vmem:[%s1496_s29 + $0x20] sm:$0xff]  ;;  %p928_p11 = scmp.ge.s32.totalorder %s927_s28, %s1929_s26  ;;  %p894_p12 = scmp.ge.s32.totalorder %s895_s27, %s1929_s26 }
 0x351   : >> { %906 = vst [vmem:[%s1492_s21 + $0x10] sm:$0xff] %v905_v48  ;;  %v911_v51 = vld [vmem:[%s1496_s29 + $0x28] sm:$0xff]  ;;  %908 = vst [vmem:[%s1492_s21 + $0x18] sm:$0xff] %v907_v49  ;;  %v913_v52 = vld [vmem:[%s1496_s29 + $0x30] sm:$0xff] }
 0x352   : >> { %910 = vst [vmem:[%s1492_s21 + $0x20] sm:$0xff] %v909_v50  ;;  %912 = vst [vmem:[%s1492_s21 + $0x28] sm:$0xff] %v911_v51  ;;  %v915_v53 = vld [vmem:[%s1496_s29 + $0x38] sm:$0xff]  ;;  %v917_v54 = vld [vmem:[%s1496_s29 + $0x40] sm:$0xff]  ;;  %s2021_s28 = smov (%p928_p11, %s927_s28), 0  ;;  %897 = sbr.rel (!%p894_p12) target bundleno = 847 (0x34f), region = 130 }
 0x353   : >> { %914 = vst [vmem:[%s1492_s21 + $0x30] sm:$0xff] %v913_v52  ;;  %916 = vst [vmem:[%s1492_s21 + $0x38] sm:$0xff] %v915_v53  ;;  %v919_v56 = vld [vmem:[%s1496_s29 + $0x48] sm:$0xff]  ;;  %v921_v55 = vld [vmem:[%s1496_s29 + $0x50] sm:$0xff]  ;;  %s930_s30 = smul.u32 104, %s2021_s28  ;;  %s2014_s24 = smov %s2021_s28 }
 0x354   : >> { %918 = vst [vmem:[%s1492_s21 + $0x40] sm:$0xff] %v917_v54  ;;  %v923_v57 = vld [vmem:[%s1496_s29 + $0x58] sm:$0xff]  ;;  %920 = vst [vmem:[%s1492_s21 + $0x48] sm:$0xff] %v919_v56  ;;  %v925_v58 = vld [vmem:[%s1496_s29 + $0x60] sm:$0xff] }
 0x355   : >> { %922 = vst [vmem:[%s1492_s21 + $0x50] sm:$0xff] %v921_v55  ;;  %924 = vst [vmem:[%s1492_s21 + $0x58] sm:$0xff] %v923_v57  ;;  %s932_s29 = scalar_lea.vmem %s1876_s14, %s930_s30 [#allocation2]  }
 0x356   : >> { %926 = vst [vmem:[%s1492_s21 + $0x60] sm:$0xff] %v925_v58  ;;  %s933_s21 = scalar_lea.vmem %s1923_s20, %s930_s30  }
 0x359 PF: > { %1432 = sdivrem.u32 %s2019_s18, 13 }
 0x35a   : > { %s1100_s6 = smul.u32 104, %s1929_s26 }
 0x35c   : > { %s938_s7 = scalar_lea.vmem %s1876_s14, %s1100_s6 [#allocation2]   ;;  %s940_s8 = scalar_lea.vmem %s1923_s20, %s1100_s6  }
 0x362   : > { %s1433_s9 = spop.drf %1432 }
 0x363   : > { %p1102_p13 = scmp.le.s32.totalorder %s1433_s9, 0 }
 0x364   : > { %s1506_s10 = smov (!%p1102_p13), %s940_s8   ;;  %s1510_s11 = smov (!%p1102_p13), %s938_s7  }
 0x365   : > { %1031 = sbr.rel (%p1102_p13) target bundleno = 886 (0x376), region = 135  ;;  %s1514_s12 = smov (!%p1102_p13), 0  }
 0x366   : > { %s1518_s13 = smov (!%p1102_p13), 0  }
 0x36c LB: >> { %v950_v60 = vld [vmem:[%s1512_s11] sm:$0xff]  ;;  %s952_s15 = sadd.s32 1, %s1516_s12  ;;  %s944_s13 = sadd.s32 1, %s1520_s13   ;;  %s1520_s13 = sphi %s1518_s13, %s944_s13   ;;  %s1516_s12 = sphi %s1514_s12, %s1515_s12   ;;  %s1512_s11 = sphi %s1510_s11, %s957_s11   ;;  %s1508_s10 = sphi %s1506_s10, %s958_s10  }
 0x36d   : >> { %951 = vst [vmem:[%s1508_s10] sm:$0xff] %v950_v60  ;;  %p953_p0 = scmp.ge.s32.totalorder %s952_s15, %s1433_s9  ;;  %p943_p1 = scmp.ge.s32.totalorder %s944_s13, %s1433_s9 }
 0x36f   : >> { %s2023_s15 = smov (%p953_p0, %s952_s15), 0  ;;  %946 = sbr.rel (!%p943_p1) target bundleno = 876 (0x36c), region = 141 }
 0x370   : >> { %s1103_s14 = sshll.u32 %s2023_s15, 3  ;;  %s1515_s12 = smov %s2023_s15  }
 0x371   : >> { %s957_s11 = scalar_lea.vmem %s938_s7, %s1103_s14 [#allocation2]   ;;  %s958_s10 = scalar_lea.vmem %s940_s8, %s1103_s14  }
 0x376 PF: > { %p12_p2 = scmp.ge.s32.totalorder %s1570_s22, 4   ;;  %s2015_s18 = smov %s1484_s19 }
 0x377   : > { %s2016_s19 = smov %s1578_s25  ;;  %s2017_s20 = smov %s1570_s22 }
 0x378   :  { %14 = sbr.rel (!%p12_p2) target bundleno = 2 (0x2), region = 152 }

</bundles_post_ra>
